<compile_context>
chip_gen: v5e
topology: v5e:2x2
jax: 0.10.0
libtpu: 0.0.40
codegen_flags: <defaults>
</compile_context>

<pallas_src>
import functools

import jax
import jax.numpy as jnp
from jax import lax
from jax.experimental import pallas as pl
from jax.experimental.pallas import tpu as pltpu

TEMP = 0.5
EPS = 1e-12            # F.normalize default eps
NEG_BIG = -1e30        # finite "-inf" for masked / out-of-range score columns (never use -inf)
ROW_TILE_TARGET = 256  # anchor rows per "parallel" row block (v7x megacore granularity)


def _cdiv(a, b):
    return -(-a // b)


def _round_up(x, m):
    return _cdiv(x, m) * m


def _l2norm_f32(x):
    # x / max(||x||, eps) == x * rsqrt(max(||x||^2, eps^2))  -> EUP rsqrt, no VPU divide
    x = x.astype(jnp.float32)
    ss = jnp.sum(x * x, axis=-1, keepdims=True)
    return x * lax.rsqrt(jnp.maximum(ss, EPS * EPS))


def _contrastive_kernel(a_ref, pos_ref, neg_ref, lse_ref, psum_ref,
                        all_sum, pos_sum, *, inv_temp, rem_last, needs_mask):
    """One anchor-row block (grid axis 0, "parallel") x one negative tile (axis 1, "arbitrary").

    a_ref   : [row_tile, D]  pre-normalized anchor rows (bf16)
    pos_ref : [P, D]         raw positives (resident block; folded in once at k == 0)
    neg_ref : [col_tile, D]  raw negatives, streamed tile-by-tile
    lse_ref : [row_tile, 1]  out: per-row logsumexp over total = [pos; neg]
    psum_ref: [row_tile, 1]  out: per-row sum_j exp(S_pos[i, j] - 1/temp)
    """
    k = pl.program_id(1)
    # Both operands are L2-normalized, so |S| <= 1/temp: a fixed compile-time max is
    # numerically safe (exp(s - m_fix) in [exp(-2/temp), ~1]) and removes the online-LSE.
    m_fix = inv_temp

    @pl.when(k == 0)
    def _positives():
        # Positive columns contribute to BOTH the positive score and the per-row
        # logsumexp over total_h = cat([positive, negative]).
        p_n = _l2norm_f32(pos_ref[...]).astype(jnp.bfloat16)
        sp = lax.dot_general(a_ref[...], p_n, (((1,), (1,)), ((), ())),
                             preferred_element_type=jnp.float32) * inv_temp
        pe = jnp.sum(jnp.exp(sp - m_fix), axis=-1, keepdims=True)
        pos_sum[...] = pe
        all_sum[...] = pe

    # Negative tile: f32 normalization math, bf16 MXU operands, f32 accumulation.
    # (On v6e/v7x with very small D the EUP exp is the binding slot; a bf16 exp would
    #  roughly double its throughput -- left in f32 here for precision.)
    t_n = _l2norm_f32(neg_ref[...]).astype(jnp.bfloat16)
    s = lax.dot_general(a_ref[...], t_n, (((1,), (1,)), ((), ())),
                        preferred_element_type=jnp.float32) * inv_temp

    last = k == pl.num_programs(1) - 1
    if needs_mask:
        # Only the last tile can contain out-of-range columns -> pay for the mask only there.
        @pl.when(jnp.logical_not(last))
        def _full_tile():
            all_sum[...] += jnp.sum(jnp.exp(s - m_fix), axis=-1, keepdims=True)

        @pl.when(last)
        def _masked_tile():
            col = lax.broadcasted_iota(jnp.int32, s.shape, 1)
            # select (not multiply): out-of-range columns may hold garbage (NaN/Inf)
            sm = jnp.where(col < rem_last, s, NEG_BIG)
            all_sum[...] += jnp.sum(jnp.exp(sm - m_fix), axis=-1, keepdims=True)
    else:
        all_sum[...] += jnp.sum(jnp.exp(s - m_fix), axis=-1, keepdims=True)

    @pl.when(last)
    def _finalize():
        lse_ref[...] = m_fix + jnp.log(all_sum[...])
        psum_ref[...] = pos_sum[...]


def contrastive_loss_pallas(anchor_h, positive_h, negative_h, temp=TEMP):
    n, d = anchor_h.shape
    n_pos = positive_h.shape[0]
    n_neg = negative_h.shape[0]
    inv_temp = float(1.0 / temp)

    # Anchor: normalize (f32 math) + cast to bf16 once in the wrapper (tiny [N, D] op).
    a_n = _l2norm_f32(anchor_h).astype(jnp.bfloat16)

    # ---------------- tiling / VMEM budget ----------------
    try:
        vmem_cap = int(pltpu.get_tpu_info().vmem_capacity_bytes)
    except Exception:
        vmem_cap = 64 << 20                       # conservative: v7x per-TensorCore VMEM
    budget = int(vmem_cap * 0.72)                 # leave headroom; never claim all of VMEM

    # Anchor row blocks (leading "parallel" axis -> both v7x TensorCores), balanced sizes.
    n8 = _round_up(n, 8)
    n_row_blocks = _cdiv(n8, ROW_TILE_TARGET)
    row_tile = _round_up(_cdiv(n8, n_row_blocks), 8)

    # Negative column tile: multiple of 256 (MXU-native); larger tiles on 128 MiB parts.
    col_cap = (2048 if d <= 2048 else 1024) if vmem_cap >= (96 << 20) else 512
    col_tile = max(256, min(col_cap, (n_neg // 256) * 256))

    neg_isz = jnp.dtype(negative_h.dtype).itemsize
    pos_isz = jnp.dtype(positive_h.dtype).itemsize

    def est_vmem(rt, ct):
        return (2 * rt * d * 2                        # bf16 anchor block (double-buffered)
                + 2 * n_pos * d * pos_isz             # positive block (double-buffered)
                + n_pos * d * 6                       # f32 + bf16 normalized positive copies
                + 2 * ct * d * neg_isz                # negative tile (double-buffered)
                + ct * d * 6                          # f32 + bf16 normalized tile copies
                + 6 * rt * ct * 4                     # scores / exp / mask live intermediates
                + 3 * rt * max(n_pos, 1) * 4          # positive-score intermediates
                + 2 * 2 * rt * 4 + 2 * rt * 4         # output blocks + scratch accumulators
                + (2 << 20))                          # slack for compiler internals

    while est_vmem(row_tile, col_tile) > budget and col_tile > 256:
        col_tile = max(256, ((col_tile // 2) // 256) * 256)
    while est_vmem(row_tile, col_tile) > budget and row_tile > 8:
        row_tile = max(8, _round_up(row_tile // 2, 8))

    n_row_blocks = _cdiv(n8, row_tile)
    n_pad = row_tile * n_row_blocks
    if n_pad != n:
        a_n = jnp.pad(a_n, ((0, n_pad - n), (0, 0)))  # zero rows; dropped in the wrapper reduction

    # No concat / pad of [P+M, D]: negatives are streamed as-is.  Only when the whole
    # negative set is smaller than a single tile do we pad it (tiny copy); otherwise the
    # partial last tile is handled by the in-kernel mask.
    neg = negative_h
    if n_neg < col_tile:
        neg = jnp.pad(neg, ((0, col_tile - n_neg), (0, 0)))
    m_rows = max(n_neg, col_tile)
    n_col_steps = _cdiv(m_rows, col_tile)
    rem_last = n_neg - (n_col_steps - 1) * col_tile
    needs_mask = rem_last != col_tile

    kernel = functools.partial(_contrastive_kernel, inv_temp=inv_temp,
                               rem_last=int(rem_last), needs_mask=bool(needs_mask))

    vmem_limit = int(min(budget, max(32 << 20, 2 * est_vmem(row_tile, col_tile))))

    lse, psum = pl.pallas_call(
        kernel,
        out_shape=(jax.ShapeDtypeStruct((n_pad, 1), jnp.float32),
                   jax.ShapeDtypeStruct((n_pad, 1), jnp.float32)),
        grid_spec=pltpu.PrefetchScalarGridSpec(
            num_scalar_prefetch=0,
            grid=(n_row_blocks, n_col_steps),
            in_specs=[
                pl.BlockSpec((row_tile, d), lambda b, k: (b, 0)),   # anchor rows (bf16, resident per b)
                pl.BlockSpec((n_pos, d), lambda b, k: (0, 0)),      # positives (resident)
                # v5e note: sweep pipeline_mode=pl.Buffered(3) here if DMA is exposed.
                pl.BlockSpec((col_tile, d), lambda b, k: (k, 0)),   # negative tiles (streamed)
            ],
            out_specs=[
                pl.BlockSpec((row_tile, 1), lambda b, k: (b, 0)),   # per-row logsumexp (total)
                pl.BlockSpec((row_tile, 1), lambda b, k: (b, 0)),   # per-row positive exp-sum
            ],
            scratch_shapes=[pltpu.VMEM((row_tile, 1), jnp.float32),    # running row sum (all cols)
                            pltpu.VMEM((row_tile, 1), jnp.float32)]),  # row sum (positive cols)
        compiler_params=pltpu.CompilerParams(
            dimension_semantics=("parallel", "arbitrary"),
            vmem_limit_bytes=vmem_limit),
        cost_estimate=pl.CostEstimate(
            flops=int(2 * n_pad * (n_pos + m_rows) * d),
            transcendentals=int(n_pad * (n_pos + m_rows) + n_pad),
            bytes_accessed=int(n_pad * d * 2 + n_pos * d * pos_isz
                               + n_row_blocks * m_rows * d * neg_isz + 2 * n_pad * 4)),
    )(a_n, positive_h, neg)

    # Tiny O(N) finalization in the wrapper (also drops padded anchor rows).
    negative_score = jnp.sum(lse[:n, 0])
    positive_score = inv_temp + jnp.log(jnp.sum(psum[:n, 0]))
    return jnp.maximum(negative_score - positive_score, jnp.float32(0.0))


def contrastive_loss_ref(anchor_h, positive_h, negative_h, temp=TEMP, bf16_matmul=False):
    # pure-JAX reference mirroring the PyTorch module
    def l2norm(x):
        nrm = jnp.sqrt(jnp.sum(x * x, axis=-1, keepdims=True))
        return x / jnp.maximum(nrm, EPS)

    a = l2norm(anchor_h)
    t = l2norm(jnp.concatenate([positive_h, negative_h], axis=0))
    p = t[: positive_h.shape[0]]
    if bf16_matmul:   # kernel-matched precision (bf16 MXU operands, f32 accumulation)
        a = a.astype(jnp.bfloat16)
        p = p.astype(jnp.bfloat16)
        t = t.astype(jnp.bfloat16)
    sp = jnp.dot(a, p.T, preferred_element_type=jnp.float32) / temp
    st = jnp.dot(a, t.T, preferred_element_type=jnp.float32) / temp
    positive_score = jax.scipy.special.logsumexp(sp)
    negative_score = jnp.sum(jax.scipy.special.logsumexp(st, axis=-1))
    return jnp.maximum(-positive_score + negative_score, 0.0)


if __name__ == "__main__":
    key = jax.random.PRNGKey(0)
    k1, k2, k3 = jax.random.split(key, 3)
    N, P, M, D = 8, 8, 16, 128
    anchor_h = jax.random.normal(k1, (N, D), dtype=jnp.float32)
    positive_h = jax.random.normal(k2, (P, D), dtype=jnp.float32)
    negative_h = jax.random.normal(k3, (M, D), dtype=jnp.float32)

    loss = jax.block_until_ready(
        contrastive_loss_pallas(anchor_h, positive_h, negative_h))

    ref_bf16 = contrastive_loss_ref(anchor_h, positive_h, negative_h, bf16_matmul=True)
    ref_f32 = contrastive_loss_ref(anchor_h, positive_h, negative_h, bf16_matmul=False)

    # tight check vs. a precision-matched reference, loose check vs. the pure-f32 module
    assert jnp.allclose(loss, ref_bf16, rtol=5e-3, atol=5e-3), (loss, ref_bf16)
    assert jnp.allclose(loss, ref_f32, rtol=2e-2, atol=2e-2), (loss, ref_f32)
    print("KERNEL_OK")
</pallas_src>

<mosaic_0001>
module attributes {stable_mosaic.version = 11 : i64} {
  func.func @_contrastive_kernel(%arg0: i32, %arg1: i32, %arg2: memref<8x128xbf16, #tpu.memory_space<vmem>>, %arg3: memref<8x128xf32, #tpu.memory_space<vmem>>, %arg4: memref<256x128xf32, #tpu.memory_space<vmem>>, %arg5: memref<8x1xf32, #tpu.memory_space<vmem>>, %arg6: memref<8x1xf32, #tpu.memory_space<vmem>>, %arg7: memref<8x1xf32, #tpu.memory_space<vmem>>, %arg8: memref<8x1xf32, #tpu.memory_space<vmem>>) attributes {dimension_semantics = [#tpu.dimension_semantics<parallel>, #tpu.dimension_semantics<arbitrary>], iteration_bounds = array<i64: 1, 1>, scalar_prefetch = 0 : i64, scratch_operands = 2 : i64, tpu.core_type = #tpu.core_type<tc>, window_params = [{transform_indices = @transform_0, window_bounds = array<i64: 8, 128>}, {pipeline_mode = #tpu.pipeline_mode<synchronous>, transform_indices = @transform_1, window_bounds = array<i64: 8, 128>}, {transform_indices = @transform_2, window_bounds = array<i64: 256, 128>}, {transform_indices = @transform_3, window_bounds = array<i64: 8, 1>}, {transform_indices = @transform_4, window_bounds = array<i64: 8, 1>}]} {
    %c0_i32 = arith.constant 0 : i32
    %0 = arith.cmpi eq, %arg1, %c0_i32 : i32
    %1 = arith.extui %0 : i1 to i32
    %c0_i32_0 = arith.constant 0 : i32
    %2 = arith.cmpi ne, %1, %c0_i32_0 : i32
    scf.if %2 {
      %c0_11 = arith.constant 0 : index
      %c0_12 = arith.constant 0 : index
      %25 = vector.load %arg3[%c0_11, %c0_12] : memref<8x128xf32, #tpu.memory_space<vmem>>, vector<8x128xf32>
      %26 = arith.mulf %25, %25 : vector<8x128xf32>
      %cst_13 = arith.constant dense<0.000000e+00> : vector<8xf32>
      %27 = vector.multi_reduction <add>, %26, %cst_13 [1] : vector<8x128xf32> to vector<8xf32>
      %28 = vector.shape_cast %27 : vector<8xf32> to vector<8x1xf32>
      %cst_14 = arith.constant 1.000000e-24 : f32
      %29 = vector.broadcast %cst_14 : f32 to vector<8x1xf32>
      %30 = arith.maximumf %28, %29 : vector<8x1xf32>
      %31 = math.rsqrt %30 : vector<8x1xf32>
      %32 = vector.broadcast %31 : vector<8x1xf32> to vector<8x128xf32>
      %33 = arith.mulf %25, %32 : vector<8x128xf32>
      %34 = arith.truncf %33 : vector<8x128xf32> to vector<8x128xbf16>
      %c0_15 = arith.constant 0 : index
      %c0_16 = arith.constant 0 : index
      %35 = vector.load %arg2[%c0_15, %c0_16] : memref<8x128xbf16, #tpu.memory_space<vmem>>, vector<8x128xbf16>
      %cst_17 = arith.constant dense<0.000000e+00> : vector<8x8xf32>
      %36 = tpu.matmul %35, %34, %cst_17 {dimension_numbers = #tpu.dot_dimension_numbers<[1], [1], [0], [0], [0, 0, 1, 0], [], []>} : vector<8x128xbf16>, vector<8x128xbf16>, vector<8x8xf32> -> vector<8x8xf32>
      %cst_18 = arith.constant 2.000000e+00 : f32
      %37 = vector.broadcast %cst_18 : f32 to vector<8x8xf32>
      %38 = arith.mulf %36, %37 : vector<8x8xf32>
      %cst_19 = arith.constant 2.000000e+00 : f32
      %39 = vector.broadcast %cst_19 : f32 to vector<8x8xf32>
      %40 = arith.subf %38, %39 : vector<8x8xf32>
      %41 = math.exp %40 : vector<8x8xf32>
      %cst_20 = arith.constant dense<0.000000e+00> : vector<8xf32>
      %42 = vector.multi_reduction <add>, %41, %cst_20 [1] : vector<8x8xf32> to vector<8xf32>
      %43 = vector.shape_cast %42 : vector<8xf32> to vector<8x1xf32>
      %c0_21 = arith.constant 0 : index
      %c0_22 = arith.constant 0 : index
      %44 = vector.load %arg8[%c0_21, %c0_22] : memref<8x1xf32, #tpu.memory_space<vmem>>, vector<8x1xf32>
      tpu.vector_store %arg8[%c0_21, %c0_22], %43 {strides = array<i32>} : memref<8x1xf32, #tpu.memory_space<vmem>>, vector<8x1xf32>,
      %c0_23 = arith.constant 0 : index
      %c0_24 = arith.constant 0 : index
      %45 = vector.load %arg7[%c0_23, %c0_24] : memref<8x1xf32, #tpu.memory_space<vmem>>, vector<8x1xf32>
      tpu.vector_store %arg7[%c0_23, %c0_24], %43 {strides = array<i32>} : memref<8x1xf32, #tpu.memory_space<vmem>>, vector<8x1xf32>,
    } else {
    }
    %c0 = arith.constant 0 : index
    %c0_1 = arith.constant 0 : index
    %3 = vector.load %arg4[%c0, %c0_1] : memref<256x128xf32, #tpu.memory_space<vmem>>, vector<256x128xf32>
    %4 = arith.mulf %3, %3 : vector<256x128xf32>
    %cst = arith.constant dense<0.000000e+00> : vector<256xf32>
    %5 = vector.multi_reduction <add>, %4, %cst [1] : vector<256x128xf32> to vector<256xf32>
    %6 = vector.shape_cast %5 : vector<256xf32> to vector<256x1xf32>
    %cst_2 = arith.constant 1.000000e-24 : f32
    %7 = vector.broadcast %cst_2 : f32 to vector<256x1xf32>
    %8 = arith.maximumf %6, %7 : vector<256x1xf32>
    %9 = math.rsqrt %8 : vector<256x1xf32>
    %10 = vector.broadcast %9 : vector<256x1xf32> to vector<256x128xf32>
    %11 = arith.mulf %3, %10 : vector<256x128xf32>
    %12 = arith.truncf %11 : vector<256x128xf32> to vector<256x128xbf16>
    %c0_3 = arith.constant 0 : index
    %c0_4 = arith.constant 0 : index
    %13 = vector.load %arg2[%c0_3, %c0_4] : memref<8x128xbf16, #tpu.memory_space<vmem>>, vector<8x128xbf16>
    %cst_5 = arith.constant dense<0.000000e+00> : vector<8x256xf32>
    %14 = tpu.matmul %13, %12, %cst_5 {dimension_numbers = #tpu.dot_dimension_numbers<[1], [1], [0], [0], [0, 0, 1, 0], [], []>} : vector<8x128xbf16>, vector<256x128xbf16>, vector<8x256xf32> -> vector<8x256xf32>
    %cst_6 = arith.constant 2.000000e+00 : f32
    %15 = vector.broadcast %cst_6 : f32 to vector<8x256xf32>
    %16 = arith.mulf %14, %15 : vector<8x256xf32>
    %c0_i32_7 = arith.constant 0 : i32
    %17 = arith.cmpi eq, %arg1, %c0_i32_7 : i32
    %true = arith.constant true
    %18 = arith.xori %17, %true : i1
    %19 = arith.extui %18 : i1 to i32
    %c0_i32_8 = arith.constant 0 : i32
    %20 = arith.cmpi ne, %19, %c0_i32_8 : i32
    scf.if %20 {
      %c0_11 = arith.constant 0 : index
      %c0_12 = arith.constant 0 : index
      %25 = vector.load %arg7[%c0_11, %c0_12] : memref<8x1xf32, #tpu.memory_space<vmem>>, vector<8x1xf32>
      %cst_13 = arith.constant 2.000000e+00 : f32
      %26 = vector.broadcast %cst_13 : f32 to vector<8x256xf32>
      %27 = arith.subf %16, %26 : vector<8x256xf32>
      %28 = math.exp %27 : vector<8x256xf32>
      %cst_14 = arith.constant dense<0.000000e+00> : vector<8xf32>
      %29 = vector.multi_reduction <add>, %28, %cst_14 [1] : vector<8x256xf32> to vector<8xf32>
      %30 = vector.shape_cast %29 : vector<8xf32> to vector<8x1xf32>
      %31 = arith.addf %25, %30 : vector<8x1xf32>
      %c0_15 = arith.constant 0 : index
      %c0_16 = arith.constant 0 : index
      %32 = vector.load %arg7[%c0_15, %c0_16] : memref<8x1xf32, #tpu.memory_space<vmem>>, vector<8x1xf32>
      tpu.vector_store %arg7[%c0_15, %c0_16], %31 {strides = array<i32>} : memref<8x1xf32, #tpu.memory_space<vmem>>, vector<8x1xf32>,
    } else {
    }
    %21 = arith.extui %17 : i1 to i32
    %c0_i32_9 = arith.constant 0 : i32
    %22 = arith.cmpi ne, %21, %c0_i32_9 : i32
    scf.if %22 {
      %25 = tpu.iota {dimensions = array<i32: 1>} : vector<8x256xi32>
      %c16_i32 = arith.constant 16 : i32
      %26 = vector.broadcast %c16_i32 : i32 to vector<8x256xi32>
      %27 = arith.cmpi slt, %25, %26 : vector<8x256xi32>
      %cst_11 = arith.constant -1.000000e+30 : f32
      %28 = vector.broadcast %cst_11 : f32 to vector<8x256xf32>
      %29 = arith.select %27, %16, %28 : vector<8x256xi1>, vector<8x256xf32>
      %c0_12 = arith.constant 0 : index
      %c0_13 = arith.constant 0 : index
      %30 = vector.load %arg7[%c0_12, %c0_13] : memref<8x1xf32, #tpu.memory_space<vmem>>, vector<8x1xf32>
      %cst_14 = arith.constant 2.000000e+00 : f32
      %31 = vector.broadcast %cst_14 : f32 to vector<8x256xf32>
      %32 = arith.subf %29, %31 : vector<8x256xf32>
      %33 = math.exp %32 : vector<8x256xf32>
      %cst_15 = arith.constant dense<0.000000e+00> : vector<8xf32>
      %34 = vector.multi_reduction <add>, %33, %cst_15 [1] : vector<8x256xf32> to vector<8xf32>
      %35 = vector.shape_cast %34 : vector<8xf32> to vector<8x1xf32>
      %36 = arith.addf %30, %35 : vector<8x1xf32>
      %c0_16 = arith.constant 0 : index
      %c0_17 = arith.constant 0 : index
      %37 = vector.load %arg7[%c0_16, %c0_17] : memref<8x1xf32, #tpu.memory_space<vmem>>, vector<8x1xf32>
      tpu.vector_store %arg7[%c0_16, %c0_17], %36 {strides = array<i32>} : memref<8x1xf32, #tpu.memory_space<vmem>>, vector<8x1xf32>,
    } else {
    }
    %23 = arith.extui %17 : i1 to i32
    %c0_i32_10 = arith.constant 0 : i32
    %24 = arith.cmpi ne, %23, %c0_i32_10 : i32
    scf.if %24 {
      %c0_11 = arith.constant 0 : index
      %c0_12 = arith.constant 0 : index
      %25 = vector.load %arg7[%c0_11, %c0_12] : memref<8x1xf32, #tpu.memory_space<vmem>>, vector<8x1xf32>
      %26 = math.log %25 : vector<8x1xf32>
      %cst_13 = arith.constant 2.000000e+00 : f32
      %27 = vector.broadcast %cst_13 : f32 to vector<8x1xf32>
      %28 = arith.addf %27, %26 : vector<8x1xf32>
      %c0_14 = arith.constant 0 : index
      %c0_15 = arith.constant 0 : index
      %29 = vector.load %arg5[%c0_14, %c0_15] : memref<8x1xf32, #tpu.memory_space<vmem>>, vector<8x1xf32>
      tpu.vector_store %arg5[%c0_14, %c0_15], %28 {strides = array<i32>} : memref<8x1xf32, #tpu.memory_space<vmem>>, vector<8x1xf32>,
      %c0_16 = arith.constant 0 : index
      %c0_17 = arith.constant 0 : index
      %30 = vector.load %arg8[%c0_16, %c0_17] : memref<8x1xf32, #tpu.memory_space<vmem>>, vector<8x1xf32>
      %c0_18 = arith.constant 0 : index
      %c0_19 = arith.constant 0 : index
      %31 = vector.load %arg6[%c0_18, %c0_19] : memref<8x1xf32, #tpu.memory_space<vmem>>, vector<8x1xf32>
      tpu.vector_store %arg6[%c0_18, %c0_19], %30 {strides = array<i32>} : memref<8x1xf32, #tpu.memory_space<vmem>>, vector<8x1xf32>,
    } else {
    }
    return
  }
  func.func @transform_0(%arg0: i32, %arg1: i32) -> (i32, i32) {
    %c0_i32 = arith.constant 0 : i32
    %c0_i32_0 = arith.constant 0 : i32
    return %arg0, %c0_i32 : i32, i32
  }
  func.func @transform_1(%arg0: i32, %arg1: i32) -> (i32, i32) {
    %c0_i32 = arith.constant 0 : i32
    %c0_i32_0 = arith.constant 0 : i32
    %c0_i32_1 = arith.constant 0 : i32
    return %c0_i32, %c0_i32_0 : i32, i32
  }
  func.func @transform_2(%arg0: i32, %arg1: i32) -> (i32, i32) {
    %c0_i32 = arith.constant 0 : i32
    %c0_i32_0 = arith.constant 0 : i32
    return %arg1, %c0_i32 : i32, i32
  }
  func.func @transform_3(%arg0: i32, %arg1: i32) -> (i32, i32) {
    %c0_i32 = arith.constant 0 : i32
    %c0_i32_0 = arith.constant 0 : i32
    return %arg0, %c0_i32 : i32, i32
  }
  func.func @transform_4(%arg0: i32, %arg1: i32) -> (i32, i32) {
    %c0_i32 = arith.constant 0 : i32
    %c0_i32_0 = arith.constant 0 : i32
    return %arg0, %c0_i32 : i32, i32
  }
}

</mosaic_0001>

<bundles_post_ra>
// kernel: tpu_custom_call.1
= control target key start
LH: loop header
LB: loop body
LE: loop exit
PB: predicated region body
PF: predicated region fallthrough
CT: control target
= control target key end

     0   :  { %10 = vsyncpa [#allocation5], 0  ;;  %s1461_s0 = inlined_call_operand.hbm [shape: bf16[8,128], index: 0, kind: input, shape index: {}]   ;;  %s1462_s1 = inlined_call_operand.hbm [shape: f32[8,128], index: 1, kind: input, shape index: {}]   ;;  %s1463_s2 = inlined_call_operand.hbm [shape: f32[256,128], index: 2, kind: input, shape index: {}]   ;;  %s1464_s3 = inlined_call_operand.vmem [shape: f32[8,1], index: 3, kind: output, shape index: {0}]   ;;  %s1465_s4 = inlined_call_operand.vmem [shape: f32[8,1], index: 4, kind: output, shape index: {1}]  }
   0x1   :  { %11 = vsyncpa [#allocation7], 0  ;;  %s28_s17 = sshll.u32 %s1462_s1, 4  ;;  %s880_s18 = smov [#allocation6]   ;;  %s29_s17 = int_to_ptr.hbm [resolvable:$true] %s28_s17 }
   0x2   :  { %s30_s19 = sshll.u32 %s880_s18, 4  ;;  %s17_s22 = sshll.u32 %s1461_s0, 4  ;;  %s31_s19 = int_to_ptr.vmem [resolvable:$true] %s30_s19  ;;  %s18_s22 = int_to_ptr.hbm [resolvable:$true] %s17_s22 }
   0x3   :  { %33 = dma.hbm_to_vmem [thread:$0]  %s29_s17, 128, %s31_s19, [#allocation7]  }
   0x4   :  { %s881_s23 = smov [#allocation4]   ;;  %s38_s27 = sshll.u32 %s1463_s2, 4  ;;  %s39_s27 = int_to_ptr.hbm [resolvable:$true] %s38_s27 }
   0x5   :  { %s19_s24 = sshll.u32 %s881_s23, 4  ;;  %s882_s1 = smov [#allocation8]   ;;  %s20_s24 = int_to_ptr.vmem [resolvable:$true] %s19_s24 }
   0x6   :  { %22 = dma.hbm_to_vmem [thread:$0]  %s18_s22, 64, %s20_s24, [#allocation5]  }
   0x7   :  { %s40_s28 = sshll.u32 %s882_s1, 4  ;;  %s883_s29 = smov 128   ;;  %s41_s28 = int_to_ptr.vmem [resolvable:$true] %s40_s28 }
   0x8   :  { %s884_s30 = smov 8  }
   0x9   :  { %46 = dma.hbm_to_vmem [thread:$0]  %s39_s27, 4096, %s41_s28, [#allocation7], %s883_s29, %s883_s29, %s884_s30  }
   0xa   :  { %876 = dma.done.wait [#allocation5], 64  }
   0xb   :  { %877 = vsyncadd [#allocation5], 4294967232 }
   0xc   :  { %878 = dma.done.wait [#allocation7], 4224  }
   0xd   :  { %879 = vsyncadd [#allocation7], 4294963072  ;;  %v920_v0 = vld [vmem:[#allocation8 + $0x70] sm:$0xff]  ;;  %v922_v1 = vld [vmem:[#allocation8 + $0x60] sm:$0xff] }
   0xe   :  { %v924_v2 = vld [vmem:[#allocation8 + $0x50] sm:$0xff]  ;;  %v152_v3 = vmul.f32 %v920_v0, %v920_v0  ;;  %v150_v4 = vmul.f32 %v922_v1, %v922_v1  ;;  %v932_v6 = vld [vmem:[#allocation8 + $0x78] sm:$0xff]  ;;  %v934_v7 = vld [vmem:[#allocation8 + $0x68] sm:$0xff] }
   0xf   :  { %v148_v5 = vmul.f32 %v924_v2, %v924_v2  ;;  %v936_v8 = vld [vmem:[#allocation8 + $0x58] sm:$0xff]  ;;  %v153_v9 = vmul.f32 %v932_v6, %v932_v6  ;;  %v151_v10 = vmul.f32 %v934_v7, %v934_v7  ;;  %v944_v12 = vld [vmem:[#allocation8 + $0x48] sm:$0xff]  ;;  %v946_v13 = vld [vmem:[#allocation8 + $0x40] sm:$0xff] }
  0x10   :  { %198 = vadd.xlane.f32.xlu0 %v152_v3  ;;  %194 = vadd.xlane.f32.xlu1 %v150_v4  ;;  %v149_v11 = vmul.f32 %v936_v8, %v936_v8  ;;  %v948_v14 = vld [vmem:[#allocation8 + $0x30] sm:$0xff]  ;;  %v147_v15 = vmul.f32 %v944_v12, %v944_v12  ;;  %v146_v16 = vmul.f32 %v946_v13, %v946_v13  ;;  %v956_v18 = vld [vmem:[#allocation8 + $0x38] sm:$0xff]  ;;  %v958_v19 = vld [vmem:[#allocation8 + $0x20] sm:$0xff] }
  0x11   :  { %190 = vadd.xlane.f32.xlu2 %v148_v5  ;;  %v144_v17 = vmul.f32 %v948_v14, %v948_v14  ;;  %v960_v20 = vld [vmem:[#allocation8 + $0x28] sm:$0xff]  ;;  %v145_v21 = vmul.f32 %v956_v18, %v956_v18  ;;  %v142_v22 = vmul.f32 %v958_v19, %v958_v19  ;;  %v968_v24 = vld [vmem:[#allocation8 + $0x18] sm:$0xff]  ;;  %v970_v25 = vld [vmem:[#allocation8 + $0x10] sm:$0xff] }
  0x12   :  { %v143_v23 = vmul.f32 %v960_v20, %v960_v20  ;;  %v972_v26 = vld [vmem:[#allocation6] sm:$0xff]  ;;  %v141_v27 = vmul.f32 %v968_v24, %v968_v24  ;;  %v140_v28 = vmul.f32 %v970_v25, %v970_v25  ;;  %v980_v30 = vld [vmem:[#allocation8 + $0x8] sm:$0xff]  ;;  %v982_v31 = vld [vmem:[#allocation8] sm:$0xff] }
  0x13   :  { %v65_v29 = vmul.f32 %v972_v26, %v972_v26  ;;  %v139_v32 = vmul.f32 %v980_v30, %v980_v30  ;;  %v138_v33 = vmul.f32 %v982_v31, %v982_v31  ;;  %v988_v34 = vld [vmem:[#allocation8 + $0xf8] sm:$0xff]  ;;  %v990_v35 = vld [vmem:[#allocation8 + $0xf0] sm:$0xff]  ;;  %v996_v38 = vld [vmem:[#allocation8 + $0xe0] sm:$0xff] }
  0x14   :  { %v169_v36 = vmul.f32 %v988_v34, %v988_v34  ;;  %v168_v37 = vmul.f32 %v990_v35, %v990_v35  ;;  %v998_v39 = vld [vmem:[#allocation8 + $0xe8] sm:$0xff]  ;;  %v166_v40 = vmul.f32 %v996_v38, %v996_v38  ;;  %v1009_v47 = vld [vmem:[#allocation8 + $0xd8] sm:$0xff]  ;;  %v1011_v48 = vld [vmem:[#allocation8 + $0xd0] sm:$0xff] }
  0x15   :  { %v167_v41 = vmul.f32 %v998_v39, %v998_v39  ;;  %v165_v49 = vmul.f32 %v1009_v47, %v1009_v47  ;;  %v164_v50 = vmul.f32 %v1011_v48, %v1011_v48 }
  0x18   :  { %200 = vadd.xlane.f32.xlu0 %v153_v9  ;;  %196 = vadd.xlane.f32.xlu1 %v151_v10 }
  0x19   :  { %192 = vadd.xlane.f32.xlu2 %v149_v11 }
  0x20   :  { %188 = vadd.xlane.f32.xlu1 %v147_v15  ;;  %186 = vadd.xlane.f32.xlu0 %v146_v16 }
  0x21   :  { %182 = vadd.xlane.f32.xlu2 %v144_v17 }
  0x28   :  { %184 = vadd.xlane.f32.xlu0 %v145_v21  ;;  %178 = vadd.xlane.f32.xlu1 %v142_v22 }
  0x29   :  { %180 = vadd.xlane.f32.xlu2 %v143_v23 }
  0x30   :  { %176 = vadd.xlane.f32.xlu1 %v141_v27  ;;  %174 = vadd.xlane.f32.xlu0 %v140_v28 }
  0x31   :  { %66 = vadd.xlane.f32.xlu2 %v65_v29  ;;  %v1055_v29 = vld [vmem:[#allocation8 + $0xc8] sm:$0xff] }
  0x38   :  { %172 = vadd.xlane.f32.xlu1 %v139_v32  ;;  %170 = vadd.xlane.f32.xlu0 %v138_v33 }
  0x39   :  { %230 = vadd.xlane.f32.xlu2 %v168_v37 }
  0x40   :  { %232 = vadd.xlane.f32.xlu0 %v169_v36  ;;  %226 = vadd.xlane.f32.xlu1 %v166_v40  ;;  %v1062_v40 = vld [vmem:[#allocation8 + $0xc0] sm:$0xff] }
  0x41   :  { %228 = vadd.xlane.f32.xlu2 %v167_v41 }
  0x48   :  { %224 = vadd.xlane.f32.xlu1 %v165_v49  ;;  %222 = vadd.xlane.f32.xlu0 %v164_v50  ;;  %v163_v49 = vmul.f32 %v1055_v29, %v1055_v29 }
  0x50   :  { %220 = vadd.xlane.f32.xlu0 %v163_v49 }
  0x83   :  { %v199_v42 = vpop.xlane.xlu0 %198  ;;  %v195_v43 = vpop.xlane.xlu1 %194 }
  0x84   :  { %v1004_v44 = vmax.f32 %v199_v42, 1e-24  ;;  %v1006_v45 = vmax.f32 %v195_v43, 1e-24  ;;  %v191_v46 = vpop.xlane.xlu2 %190 }
  0x85   :  { %v1018_v51 = vmax.f32 %v191_v46, 1e-24 }
  0x86   :  { %730 = vrsqrt.f32 %v1004_v44  ;;  %vm412_vm1 = vweird.f32 %v1004_v44  ;;  %vm392_vm2 = vweird.f32 %v1006_v45 }
  0x87   :  { %732 = vrsqrt.f32 %v1006_v45  ;;  %vm372_vm12 = vweird.f32 %v1018_v51 }
  0x88   :  { %734 = vrsqrt.f32 %v1018_v51 }
  0x8b   :  { %v201_v52 = vpop.xlane.xlu0 %200  ;;  %v197_v53 = vpop.xlane.xlu1 %196 }
  0x8c   :  { %v1020_v54 = vpop.eup %730  ;;  %v1022_v55 = vmax.f32 %v201_v52, 1e-24  ;;  %v1024_v56 = vmax.f32 %v197_v53, 1e-24  ;;  %v193_v57 = vpop.xlane.xlu2 %192 }
  0x8d   :  { %v1026_v58 = vpop.eup %732  ;;  %v407_v59 = vmul.f32 %v1020_v54, %v1004_v44  ;;  %v1031_v60 = vmax.f32 %v193_v57, 1e-24  ;;  %vm413_vm0 = vweird.f32 %v1020_v54  ;;  %v162_v57 = vmul.f32 %v1062_v40, %v1062_v40 }
  0x8e   :  { %736 = vrsqrt.f32 %v1022_v55  ;;  %v387_v62 = vmul.f32 %v1026_v58, %v1006_v45  ;;  %v1039_v3 = vpop.eup %734  ;;  %vm422_vm3 = vweird.f32 %v1022_v55  ;;  %vm1085_vm5 = vmor %vm412_vm1, %vm413_vm0  ;;  %vm393_vm6 = vweird.f32 %v1026_v58 }
  0x8f   :  { %v408_v61 = vmul.f32 %v1020_v54, %v407_v59  ;;  %738 = vrsqrt.f32 %v1024_v56  ;;  %v367_v41 = vmul.f32 %v1039_v3, %v1018_v51  ;;  %218 = vadd.xlane.f32.xlu2 %v162_v57  ;;  %vm402_vm7 = vweird.f32 %v1024_v56  ;;  %vm1127_vm11 = vmor %vm392_vm2, %vm393_vm6 }
  0x90   :  { %740 = vrsqrt.f32 %v1031_v60  ;;  %v388_v10 = vmul.f32 %v1026_v58, %v387_v62  ;;  %vm382_vm13 = vweird.f32 %v1031_v60  ;;  %vm373_vm15 = vweird.f32 %v1039_v3 }
  0x91   :  { %v409_v63 = vmul.f32 0.5, %v408_v61  ;;  %vm1180_vm1 = vmor %vm372_vm12, %vm373_vm15 }
  0x92   :  { %v389_v32 = vmul.f32 0.5, %v388_v10 }
  0x93   :  { %v189_v4 = vpop.xlane.xlu1 %188  ;;  %v187_v5 = vpop.xlane.xlu0 %186  ;;  %v410_v21 = vsub.f32 1.5, %v409_v63 }
  0x94   :  { %v737_v9 = vpop.eup %736  ;;  %v1042_v11 = vmax.f32 %v189_v4, 1e-24  ;;  %v1044_v15 = vmax.f32 %v187_v5, 1e-24  ;;  %v183_v16 = vpop.xlane.xlu2 %182  ;;  %v390_v61 = vsub.f32 1.5, %v389_v32 }
  0x95   :  { %v1046_v17 = vpop.eup %738  ;;  %v417_v22 = vmul.f32 %v737_v9, %v1022_v55  ;;  %v1060_v37 = vmax.f32 %v183_v16, 1e-24  ;;  %v411_v43 = vmul.f32 %v1020_v54, %v410_v21  ;;  %vm423_vm4 = vweird.f32 %v737_v9 }
  0x96   :  { %v1049_v23 = vpop.eup %740  ;;  %v397_v27 = vmul.f32 %v1046_v17, %v1024_v56  ;;  %742 = vrsqrt.f32 %v1042_v11  ;;  %v368_v16 = vmul.f32 %v1039_v3, %v367_v41  ;;  %vm424_vm8 = vmor %vm422_vm3, %vm423_vm4  ;;  %vm403_vm9 = vweird.f32 %v1046_v17 }
  0x97   :  { %v418_v28 = vmul.f32 %v737_v9, %v417_v22  ;;  %744 = vrsqrt.f32 %v1044_v15  ;;  %v377_v36 = vmul.f32 %v1049_v23, %v1031_v60  ;;  %v415_v22 = vsel %vm1085_vm5, %v1020_v54, %v411_v43  ;;  %vm1116_vm10 = vmor %vm402_vm7, %vm403_vm9 }
  0x98   :  { %v398_v33 = vmul.f32 %v1046_v17, %v397_v27  ;;  %746 = vrsqrt.f32 %v1060_v37  ;;  %v369_v43 = vmul.f32 0.5, %v368_v16  ;;  %vm383_vm14 = vweird.f32 %v1049_v23 }
  0x99   :  { %v419_v42 = vmul.f32 0.5, %v418_v28  ;;  %v378_v62 = vmul.f32 %v1049_v23, %v377_v36  ;;  %v600_v36 = vmul.f32 %v415_v22, %v920_v0  ;;  %vm1162_vm0 = vmor %vm382_vm13, %vm383_vm14  ;;  %vm352_vm2 = vweird.f32 %v1044_v15 }
  0x9a   :  { %v399_v46 = vmul.f32 0.5, %v398_v33  ;;  %vm362_vm4 = vweird.f32 %v1042_v11  ;;  %vm332_vm6 = vweird.f32 %v1060_v37 }
  0x9b   :  { %v420_v50 = vsub.f32 1.5, %v419_v42  ;;  %v185_v52 = vpop.xlane.xlu0 %184  ;;  %v179_v53 = vpop.xlane.xlu1 %178  ;;  %v379_v33 = vmul.f32 0.5, %v378_v62  ;;  %v391_v42 = vmul.f32 %v1026_v58, %v390_v61 }
  0x9c   :  { %v1075_v59 = vpop.eup %742  ;;  %v1078_v63 = vmax.f32 %v185_v52, 1e-24  ;;  %v181_v5 = vpop.xlane.xlu2 %180  ;;  %v400_v21 = vsub.f32 1.5, %v399_v46  ;;  %v1106_v32 = vmax.f32 %v179_v53, 1e-24 }
  0x9d   :  { %v1089_v10 = vpop.eup %744  ;;  %v421_v27 = vmul.f32 %v737_v9, %v420_v50  ;;  %v357_v54 = vmul.f32 %v1075_v59, %v1042_v11  ;;  %v1121_v52 = vmax.f32 %v181_v5, 1e-24  ;;  %v380_v61 = vsub.f32 1.5, %v379_v33  ;;  %v1158_v33 = vld [vmem:[#allocation8 + $0xb8] sm:$0xff] }
  0x9e   :  { %v347_v44 = vmul.f32 %v1089_v10, %v1044_v15  ;;  %748 = vrsqrt.f32 %v1078_v63  ;;  %v401_v46 = vmul.f32 %v1046_v17, %v400_v21  ;;  %v1112_v55 = vpop.eup %746  ;;  %v395_v45 = vsel %vm1127_vm11, %v1026_v58, %v391_v42  ;;  %v1148_v21 = vld [vmem:[#allocation8 + $0xb0] sm:$0xff] }
  0x9f   :  { %v425_v28 = vsel %vm424_vm8, %v737_v9, %v421_v27  ;;  %750 = vrsqrt.f32 %v1106_v32  ;;  %v370_v5 = vsub.f32 1.5, %v369_v43  ;;  %v160_v42 = vmul.f32 %v1148_v21, %v1148_v21 }
  0xa0   :  { %v601_v41 = vmul.f32 %v425_v28, %v932_v6  ;;  %v348_v9 = vmul.f32 %v1089_v10, %v347_v44  ;;  %v358_v6 = vmul.f32 %v1075_v59, %v357_v54  ;;  %v405_v56 = vsel %vm1116_vm10, %v1046_v17, %v401_v46 }
  0xa1   :  { %v327_v17 = vmul.f32 %v1112_v55, %v1060_v37  ;;  %752 = vrsqrt.f32 %v1121_v52  ;;  %v599_v27 = vmul.f32 %v405_v56, %v934_v7  ;;  %v598_v54 = vmul.f32 %v395_v45, %v922_v1  ;;  %214 = vadd.xlane.f32.xlu1 %v160_v42 }
  0xa2   :  { %v625_v50 = vpack.c.bf16 %v601_v41, %v600_v36  ;;  %v349_v22 = vmul.f32 0.5, %v348_v9  ;;  %v359_v58 = vmul.f32 0.5, %v358_v6  ;;  %v381_v7 = vmul.f32 %v1049_v23, %v380_v61 }
  0xa3   :  { %v177_v53 = vpop.xlane.xlu1 %176  ;;  %v175_v62 = vpop.xlane.xlu0 %174  ;;  %v328_v43 = vmul.f32 %v1112_v55, %v327_v17  ;;  %v371_v46 = vmul.f32 %v1039_v3, %v370_v5  ;;  %v624_v9 = vpack.c.bf16 %v599_v27, %v598_v54  ;;  %vm353_vm3 = vweird.f32 %v1089_v10  ;;  %v1223_v54 = vld [vmem:[#allocation8 + $0xa0] sm:$0xff] }
  0xa4   :  { %v1136_v57 = vpop.eup %748  ;;  %635 = vmatpush.bf16.xpose.msra.mxu1 %v625_v50  ;;  %v67_v4 = vpop.xlane.xlu2 %66  ;;  %v1156_v28 = vmax.f32 %v177_v53, 1e-24  ;;  %v1166_v41 = vmax.f32 %v175_v62, 1e-24  ;;  %v350_v49 = vsub.f32 1.5, %v349_v22  ;;  %v161_v50 = vmul.f32 %v1158_v33, %v1158_v33  ;;  %vm1212_vm7 = vmor %vm352_vm2, %vm353_vm3 }
  0xa5   :  { %v1146_v16 = vmax.f32 %v67_v4, 1e-24  ;;  %v337_v44 = vmul.f32 %v1136_v57, %v1078_v63  ;;  %v1172_v1 = vpop.eup %750  ;;  %v360_v0 = vsub.f32 1.5, %v359_v58  ;;  %v385_v56 = vsel %vm1162_vm0, %v1049_v23, %v381_v7 }
  0xa6   :  { %v307_v53 = vmul.f32 %v1172_v1, %v1106_v32  ;;  %216 = vadd.xlane.f32.xlu2 %v161_v50  ;;  %vm363_vm5 = vweird.f32 %v1075_v59  ;;  %v329_v61 = vmul.f32 0.5, %v328_v43  ;;  %v375_v23 = vsel %vm1180_vm1, %v1039_v3, %v371_v46 }
  0xa7   :  { %754 = vrsqrt.f32 %v1146_v16  ;;  %v338_v6 = vmul.f32 %v1136_v57, %v337_v44  ;;  %v1191_v51 = vpop.eup %752  ;;  %v597_v4 = vmul.f32 %v385_v56, %v936_v8  ;;  %v351_v17 = vmul.f32 %v1089_v10, %v350_v49  ;;  %v1221_v44 = vld [vmem:[#allocation8 + $0xa8] sm:$0xff]  ;;  %vm1229_vm8 = vmor %vm362_vm4, %vm363_vm5  ;;  %v1244_v49 = vld [vmem:[#allocation8 + $0x90] sm:$0xff] }
  0xa8   :  { %756 = vrsqrt.f32 %v1156_v28  ;;  %v317_v3 = vmul.f32 %v1191_v51, %v1121_v52  ;;  %v361_v8 = vmul.f32 %v1075_v59, %v360_v0  ;;  %vm342_vm9 = vweird.f32 %v1078_v63 }
  0xa9   :  { %758 = vrsqrt.f32 %v1166_v41  ;;  %v339_v27 = vmul.f32 0.5, %v338_v6  ;;  %v308_v36 = vmul.f32 %v1172_v1, %v307_v53  ;;  %v596_v7 = vmul.f32 %v375_v23, %v924_v2 }
  0xaa   :  { %v330_v46 = vsub.f32 1.5, %v329_v61  ;;  %vm333_vm10 = vweird.f32 %v1112_v55  ;;  %v355_v2 = vsel %vm1212_vm7, %v1089_v10, %v351_v17  ;;  %v159_v0 = vmul.f32 %v1221_v44, %v1221_v44  ;;  %v1269_v17 = vld [vmem:[#allocation8 + $0x80] sm:$0xff] }
  0xab   :  { %v173_v45 = vpop.xlane.xlu1 %172  ;;  %v171_v5 = vpop.xlane.xlu0 %170  ;;  %v623_v50 = vpack.c.bf16 %v597_v4, %v596_v7  ;;  %v158_v6 = vmul.f32 %v1223_v54, %v1223_v54  ;;  %v340_v56 = vsub.f32 1.5, %v339_v27  ;;  %v318_v53 = vmul.f32 %v1191_v51, %v317_v3  ;;  %vm1275_vm12 = vmor %vm332_vm6, %vm333_vm10  ;;  %v1280_v3 = vld [vmem:[#allocation8 + $0x98] sm:$0xff] }
  0xac   :  { %636 = vmatpush.bf16.xpose.msra.mxu1 %v624_v9  ;;  %v1236_v42 = vmax.f32 %v173_v45, 1e-24  ;;  %v1242_v11 = vmax.f32 %v171_v5, 1e-24  ;;  %v365_v23 = vsel %vm1229_vm8, %v1075_v59, %v361_v8  ;;  %vm343_vm11 = vweird.f32 %v1136_v57  ;;  %212 = vadd.xlane.f32.xlu1 %v159_v0 }
  0xad   :  { %v1203_v62 = vpop.eup %754  ;;  %v309_v45 = vmul.f32 0.5, %v308_v36  ;;  %v156_v10 = vmul.f32 %v1244_v49, %v1244_v49  ;;  %v594_v59 = vmul.f32 %v355_v2, %v946_v13  ;;  %210 = vadd.xlane.f32.xlu0 %v158_v6  ;;  %v595_v27 = vmul.f32 %v365_v23, %v944_v12  ;;  %v1290_v36 = vld [vmem:[#allocation8 + $0x88] sm:$0xff]  ;;  %vm1296_vm0 = vmor %vm342_vm9, %vm343_vm11  ;;  %v81_v12 = vld [vmem:[#allocation4] sm:$0xf] }
  0xae   :  { %v70_v58 = vmul.f32 %v1203_v62, %v1146_v16  ;;  %v1238_v43 = vpop.eup %756  ;;  %760 = vrsqrt.f32 %v1236_v42  ;;  %vm75_vm13 = vweird.f32 %v1146_v16  ;;  %vm76_vm14 = vweird.f32 %v1203_v62 }
  0xaf   :  { %v1246_v9 = vpop.eup %758  ;;  %v297_v4 = vmul.f32 %v1238_v43, %v1156_v28  ;;  %762 = vrsqrt.f32 %v1242_v11  ;;  %206 = vadd.xlane.f32.xlu2 %v156_v10  ;;  %v319_v13 = vmul.f32 0.5, %v318_v53  ;;  %v331_v8 = vmul.f32 %v1112_v55, %v330_v46  ;;  %vm1286_vm15 = vmor %vm75_vm13, %vm76_vm14 }
  0xb0   :  { %v71_v60 = vmul.f32 %v1203_v62, %v70_v58  ;;  %v287_v5 = vmul.f32 %v1246_v9, %v1166_v41  ;;  %v341_v15 = vmul.f32 %v1136_v57, %v340_v56  ;;  %v154_v7 = vmul.f32 %v1269_v17, %v1269_v17 }
  0xb1   :  { %v310_v46 = vsub.f32 1.5, %v309_v45  ;;  %v622_v63 = vpack.c.bf16 %v595_v27, %v594_v59  ;;  %v155_v56 = vmul.f32 %v1290_v36, %v1290_v36  ;;  %v335_v23 = vsel %vm1275_vm12, %v1112_v55, %v331_v8 }
  0xb2   :  { %v72_v61 = vmul.f32 0.5, %v71_v60  ;;  %v298_v60 = vmul.f32 %v1238_v43, %v297_v4  ;;  %v288_v0 = vmul.f32 %v1246_v9, %v287_v5  ;;  %v345_v45 = vsel %vm1296_vm0, %v1136_v57, %v341_v15 }
  0xb3   :  { %vm312_vm1 = vweird.f32 %v1106_v32  ;;  %vm313_vm2 = vweird.f32 %v1172_v1  ;;  %vm322_vm3 = vweird.f32 %v1121_v52  ;;  %vm323_vm4 = vweird.f32 %v1191_v51 }
  0xb4   :  { %637 = vmatpush.bf16.xpose.msra.mxu1 %v623_v50  ;;  %v73_v58 = vsub.f32 1.5, %v72_v61  ;;  %v157_v50 = vmul.f32 %v1280_v3, %v1280_v3  ;;  %v1306_v2 = vpop.eup %760  ;;  %v320_v61 = vsub.f32 1.5, %v319_v13  ;;  %202 = vadd.xlane.f32.xlu1 %v154_v7  ;;  %v299_v4 = vmul.f32 0.5, %v298_v60  ;;  %vm1329_vm5 = vmor %vm312_vm1, %vm313_vm2 }
  0xb5   :  { %v1314_v53 = vpop.eup %762  ;;  %v289_v55 = vmul.f32 0.5, %v288_v0  ;;  %v592_v5 = vmul.f32 %v335_v23, %v948_v14  ;;  %v593_v57 = vmul.f32 %v345_v45, %v956_v18  ;;  %v277_v32 = vmul.f32 %v1306_v2, %v1236_v42  ;;  %vm324_vm6 = vmor %vm322_vm3, %vm323_vm4  ;;  %v231_v45 = vpop.xlane.xlu2 %230 }
  0xb6   :  { %v74_v16 = vmul.f32 %v1203_v62, %v73_v58  ;;  %208 = vadd.xlane.f32.xlu0 %v157_v50  ;;  %v267_v59 = vmul.f32 %v1314_v53, %v1242_v11  ;;  %v311_v22 = vmul.f32 %v1172_v1, %v310_v46  ;;  %v321_v27 = vmul.f32 %v1191_v51, %v320_v61 }
  0xb7   :  { %204 = vadd.xlane.f32.xlu2 %v155_v56  ;;  %v300_v14 = vsub.f32 1.5, %v299_v4  ;;  %v290_v18 = vsub.f32 1.5, %v289_v55  ;;  %v621_v58 = vpack.c.bf16 %v593_v57, %v592_v5  ;;  %v278_v13 = vmul.f32 %v1306_v2, %v277_v32 }
  0xb8   :  { %v78_v6 = vsel %vm1286_vm15, %v1203_v62, %v74_v16  ;;  %v268_v8 = vmul.f32 %v1314_v53, %v267_v59  ;;  %v315_v15 = vsel %vm1329_vm5, %v1172_v1, %v311_v22  ;;  %v325_v37 = vsel %vm324_vm6, %v1191_v51, %v321_v27 }
  0xb9   :  { %v79_v10 = vmul.f32 %v78_v6, %v972_v26  ;;  %vm302_vm7 = vweird.f32 %v1156_v28  ;;  %vm303_vm8 = vweird.f32 %v1238_v43  ;;  %vm292_vm9 = vweird.f32 %v1166_v41 }
  0xba   :  { %vm293_vm10 = vweird.f32 %v1246_v9  ;;  %v590_v52 = vmul.f32 %v315_v15, %v958_v19  ;;  %v591_v16 = vmul.f32 %v325_v37, %v960_v20  ;;  %vm1353_vm11 = vmor %vm302_vm7, %vm303_vm8  ;;  %v279_v1 = vmul.f32 0.5, %v278_v13 }
  0xbb   :  { %v80_v62 = vpack.c.bf16 %v79_v10, %v79_v10  ;;  %v269_v51 = vmul.f32 0.5, %v268_v8  ;;  %v291_v28 = vmul.f32 %v1246_v9, %v290_v18  ;;  %v301_v46 = vmul.f32 %v1238_v43, %v300_v14  ;;  %vm294_vm12 = vmor %vm292_vm9, %vm293_vm10 }
  0xbc   :  { %638 = vmatpush.bf16.xpose.msra.mxu1 %v622_v63  ;;  %v620_v60 = vpack.c.bf16 %v591_v16, %v590_v52  ;;  %v280_v41 = vsub.f32 1.5, %v279_v1  ;;  %vm282_vm13 = vweird.f32 %v1236_v42  ;;  %vm283_vm14 = vweird.f32 %v1306_v2 }
  0xbd   :  { %89 = vmatpush.bf16.xpose.msra.mxu0 %v80_v62  ;;  %v270_v50 = vsub.f32 1.5, %v269_v51  ;;  %v295_v0 = vsel %vm294_vm12, %v1246_v9, %v291_v28  ;;  %v305_v19 = vsel %vm1353_vm11, %v1238_v43, %v301_v46  ;;  %vm272_vm15 = vweird.f32 %v1242_v11  ;;  %vm284_vm1 = vmor %vm282_vm13, %vm283_vm14  ;;  %v229_v4 = vpop.xlane.xlu2 %228 }
  0xbe   :  { %vm273_vm0 = vweird.f32 %v1314_v53  ;;  %v588_v20 = vmul.f32 %v295_v0, %v970_v25  ;;  %v589_v63 = vmul.f32 %v305_v19, %v968_v24  ;;  %v281_v6 = vmul.f32 %v1306_v2, %v280_v41  ;;  %v1375_v25 = vld [vmem:[#allocation4] sm:$0xf]  ;;  %v233_v24 = vpop.xlane.xlu0 %232 }
  0xbf   :  { %v271_v9 = vmul.f32 %v1314_v53, %v270_v50  ;;  %vm274_vm2 = vmor %vm272_vm15, %vm273_vm0  ;;  %v265_v10 = vmax.f32 %v233_v24, 1e-24  ;;  %v264_v62 = vmax.f32 %v231_v45, 1e-24  ;;  %v263_v5 = vmax.f32 %v229_v4, 1e-24 }
  0xc0   :  { %v619_v43 = vpack.c.bf16 %v589_v63, %v588_v20  ;;  %v285_v56 = vsel %vm284_vm1, %v1306_v2, %v281_v6 }
  0xc1   :  { %v275_v42 = vsel %vm274_vm2, %v1314_v53, %v271_v9  ;;  %v587_v61 = vmul.f32 %v285_v56, %v980_v30  ;;  %764 = vrsqrt.f32 %v265_v10  ;;  %v227_v53 = vpop.xlane.xlu1 %226  ;;  %vm572_vm3 = vweird.f32 %v264_v62 }
  0xc2   :  { %v586_v11 = vmul.f32 %v275_v42, %v982_v31  ;;  %766 = vrsqrt.f32 %v264_v62  ;;  %v262_v55 = vmax.f32 %v227_v53, 1e-24  ;;  %vm582_vm4 = vweird.f32 %v265_v10 }
  0xc3   :  { %vm562_vm11 = vweird.f32 %v263_v5 }
  0xc4   :  { %639 = vmatpush.bf16.xpose.msra.mxu1 %v621_v58  ;;  %90 = vmatmul.bf16.vlgmr.msra.gmra.mxu0 %v81_v12  ;;  %v618_v23 = vpack.c.bf16 %v587_v61, %v586_v11  ;;  %768 = vrsqrt.f32 %v262_v55  ;;  %vm552_vm9 = vweird.f32 %v262_v55 }
  0xc5   :  { %770 = vrsqrt.f32 %v263_v5 }
  0xc6   :  { %v223_v13 = vpop.xlane.xlu0 %222 }
  0xc7   :  { %v765_v2 = vpop.eup %764  ;;  %v260_v37 = vmax.f32 %v223_v13, 1e-24 }
  0xc8   :  { %v767_v31 = vpop.eup %766  ;;  %v577_v57 = vmul.f32 %v765_v2, %v265_v10  ;;  %vm583_vm7 = vweird.f32 %v765_v2 }
  0xc9   :  { %v567_v30 = vmul.f32 %v767_v31, %v264_v62  ;;  %v225_v58 = vpop.xlane.xlu1 %224  ;;  %vm573_vm5 = vweird.f32 %v767_v31  ;;  %vm584_vm8 = vmor %vm582_vm4, %vm583_vm7  ;;  %vm532_vm1 = vweird.f32 %v260_v37 }
  0xca   :  { %v578_v26 = vmul.f32 %v765_v2, %v577_v57  ;;  %v769_v27 = vpop.eup %768  ;;  %v261_v15 = vmax.f32 %v225_v58, 1e-24  ;;  %vm574_vm6 = vmor %vm572_vm3, %vm573_vm5 }
  0xcb   :  { %v568_v32 = vmul.f32 %v767_v31, %v567_v30  ;;  %v771_v14 = vpop.eup %770  ;;  %v547_v12 = vmul.f32 %v769_v27, %v262_v55  ;;  %vm553_vm10 = vweird.f32 %v769_v27 }
  0xcc   :  { %640 = vmatpush.bf16.xpose.msra.mxu1 %v620_v60  ;;  %v579_v59 = vmul.f32 0.5, %v578_v26  ;;  %v557_v52 = vmul.f32 %v771_v14, %v263_v5  ;;  %772 = vrsqrt.f32 %v261_v15  ;;  %vm563_vm12 = vweird.f32 %v771_v14  ;;  %vm554_vm13 = vmor %vm552_vm9, %vm553_vm10 }
  0xcd   :  { %v569_v22 = vmul.f32 0.5, %v568_v32  ;;  %774 = vrsqrt.f32 %v260_v37  ;;  %v548_v51 = vmul.f32 %v769_v27, %v547_v12  ;;  %vm564_vm14 = vmor %vm562_vm11, %vm563_vm12  ;;  %vm542_vm15 = vweird.f32 %v261_v15 }
  0xce   :  { %v580_v8 = vsub.f32 1.5, %v579_v59  ;;  %v558_v28 = vmul.f32 %v771_v14, %v557_v52 }
  0xcf   :  { %v570_v18 = vsub.f32 1.5, %v569_v22  ;;  %v549_v20 = vmul.f32 0.5, %v548_v51 }
  0xd0   :  { %v581_v7 = vmul.f32 %v765_v2, %v580_v8  ;;  %v559_v63 = vmul.f32 0.5, %v558_v28 }
  0xd1   :  { %v571_v16 = vmul.f32 %v767_v31, %v570_v18 }
  0xd2   :  { %v585_v46 = vsel %vm584_vm8, %v765_v2, %v581_v7  ;;  %v773_v50 = vpop.eup %772  ;;  %v560_v42 = vsub.f32 1.5, %v559_v63 }
  0xd3   :  { %v575_v1 = vsel %vm574_vm6, %v767_v31, %v571_v16  ;;  %v617_v41 = vmul.f32 %v585_v46, %v988_v34  ;;  %v775_v0 = vpop.eup %774  ;;  %v537_v9 = vmul.f32 %v773_v50, %v261_v15  ;;  %vm543_vm0 = vweird.f32 %v773_v50 }
  0xd4   :  { %641 = vmatpush.bf16.xpose.msra.mxu1 %v619_v43  ;;  %v616_v60 = vmul.f32 %v575_v1, %v990_v35  ;;  %v527_v6 = vmul.f32 %v775_v0, %v260_v37  ;;  %v550_v43 = vsub.f32 1.5, %v549_v20  ;;  %v221_v35 = vpop.xlane.xlu0 %220  ;;  %v561_v61 = vmul.f32 %v771_v14, %v560_v42  ;;  %vm544_vm3 = vmor %vm542_vm15, %vm543_vm0 }
  0xd5   :  { %v538_v56 = vmul.f32 %v773_v50, %v537_v9  ;;  %v259_v45 = vmax.f32 %v221_v35, 1e-24  ;;  %vm533_vm2 = vweird.f32 %v775_v0 }
  0xd6   :  { %v633_v19 = vpack.c.bf16 %v617_v41, %v616_v60  ;;  %v528_v11 = vmul.f32 %v775_v0, %v527_v6  ;;  %v551_v34 = vmul.f32 %v769_v27, %v550_v43  ;;  %v565_v4 = vsel %vm564_vm14, %v771_v14, %v561_v61  ;;  %vm534_vm4 = vmor %vm532_vm1, %vm533_vm2 }
  0xd7   :  { %776 = vrsqrt.f32 %v259_v45  ;;  %v615_v55 = vmul.f32 %v565_v4, %v998_v39  ;;  %vm522_vm5 = vweird.f32 %v259_v45 }
  0xd8   :  { %648 = vmatpush.bf16.xpose.msra.mxu2 %v633_v19  ;;  %v529_v24 = vmul.f32 0.5, %v528_v11  ;;  %v555_v53 = vsel %vm554_vm13, %v769_v27, %v551_v34 }
  0xd9   :  { %v614_v2 = vmul.f32 %v555_v53, %v996_v38 }
  0xda   :  { %v530_v31 = vsub.f32 1.5, %v529_v24 }
  0xdb   :  { %v632_v57 = vpack.c.bf16 %v615_v55, %v614_v2 }
  0xdc   :  { %642 = vmatpush.bf16.xpose.msra.mxu1 %v618_v23  ;;  %v539_v23 = vmul.f32 0.5, %v538_v56  ;;  %v531_v26 = vmul.f32 %v775_v0, %v530_v31 }
  0xdd   :  { %v777_v30 = vpop.eup %776 }
  0xde   :  { %v540_v5 = vsub.f32 1.5, %v539_v23  ;;  %v517_v22 = vmul.f32 %v777_v30, %v259_v45  ;;  %v535_v38 = vsel %vm534_vm4, %v775_v0, %v531_v26  ;;  %vm523_vm6 = vweird.f32 %v777_v30 }
  0xdf   :  { %v612_v18 = vmul.f32 %v535_v38, %v1011_v48  ;;  %vm524_vm9 = vmor %vm522_vm5, %vm523_vm6 }
  0xe0   :  { %649 = vmatpush.bf16.xpose.msra.mxu2 %v632_v57  ;;  %v541_v32 = vmul.f32 %v773_v50, %v540_v5  ;;  %v518_v39 = vmul.f32 %v777_v30, %v517_v22 }
  0xe2   :  { %v545_v14 = vsel %vm544_vm3, %v773_v50, %v541_v32  ;;  %v519_v8 = vmul.f32 0.5, %v518_v39 }
  0xe3   :  { %643 = vmatmul.bf16.vlgmr.msra.gmra.mxu1 %v1375_v25  ;;  %v613_v58 = vmul.f32 %v545_v14, %v1009_v47 }
  0xe4   :  { %v520_v16 = vsub.f32 1.5, %v519_v8 }
  0xe5   :  { %v631_v37 = vpack.c.bf16 %v613_v58, %v612_v18 }
  0xe6   :  { %v521_v48 = vmul.f32 %v777_v30, %v520_v16 }
  0xe8   :  { %650 = vmatpush.bf16.xpose.msra.mxu2 %v631_v37  ;;  %v525_v28 = vsel %vm524_vm9, %v777_v30, %v521_v48 }
  0xe9   :  { %v611_v60 = vmul.f32 %v525_v28, %v1055_v29 }
 0x102   :  { %v219_v10 = vpop.xlane.xlu2 %218 }
 0x103   :  { %v258_v62 = vmax.f32 %v219_v10, 1e-24 }
 0x105   :  { %778 = vrsqrt.f32 %v258_v62  ;;  %vm512_vm7 = vweird.f32 %v258_v62 }
 0x10b   :  { %v779_v59 = vpop.eup %778 }
 0x10c   :  { %v507_v27 = vmul.f32 %v779_v59, %v258_v62  ;;  %vm513_vm8 = vweird.f32 %v779_v59 }
 0x10d   :  { %vm514_vm10 = vmor %vm512_vm7, %vm513_vm8 }
 0x10e   :  { %v508_v13 = vmul.f32 %v779_v59, %v507_v27 }
 0x110   :  { %v509_v12 = vmul.f32 0.5, %v508_v13 }
 0x112   :  { %v510_v1 = vsub.f32 1.5, %v509_v12 }
 0x114   :  { %v215_v15 = vpop.xlane.xlu1 %214  ;;  %v511_v47 = vmul.f32 %v779_v59, %v510_v1 }
 0x115   :  { %v256_v52 = vmax.f32 %v215_v15, 1e-24 }
 0x116   :  { %v515_v46 = vsel %vm514_vm10, %v779_v59, %v511_v47 }
 0x117   :  { %780 = vrsqrt.f32 %v256_v52  ;;  %v610_v41 = vmul.f32 %v515_v46, %v1062_v40  ;;  %vm492_vm11 = vweird.f32 %v256_v52 }
 0x119   :  { %v217_v7 = vpop.xlane.xlu2 %216  ;;  %v630_v20 = vpack.c.bf16 %v611_v60, %v610_v41 }
 0x11a   :  { %v257_v51 = vmax.f32 %v217_v7, 1e-24 }
 0x11b   :  { %651 = vmatpush.bf16.xpose.msra.mxu2 %v630_v20 }
 0x11c   :  { %782 = vrsqrt.f32 %v257_v51  ;;  %vm502_vm14 = vweird.f32 %v257_v51 }
 0x11d   :  { %v781_v50 = vpop.eup %780 }
 0x11e   :  { %v487_v0 = vmul.f32 %v781_v50, %v256_v52  ;;  %vm493_vm12 = vweird.f32 %v781_v50 }
 0x11f   :  { %v213_v19 = vpop.xlane.xlu1 %212  ;;  %vm1389_vm13 = vmor %vm492_vm11, %vm493_vm12 }
 0x120   :  { %v255_v9 = vmax.f32 %v213_v19, 1e-24  ;;  %v211_v6 = vpop.xlane.xlu0 %210  ;;  %v488_v43 = vmul.f32 %v781_v50, %v487_v0 }
 0x121   :  { %v254_v56 = vmax.f32 %v211_v6, 1e-24 }
 0x122   :  { %v783_v63 = vpop.eup %782  ;;  %v207_v11 = vpop.xlane.xlu2 %206  ;;  %784 = vrsqrt.f32 %v255_v9  ;;  %v489_v34 = vmul.f32 0.5, %v488_v43  ;;  %vm482_vm1 = vweird.f32 %v255_v9 }
 0x123   :  { %v497_v42 = vmul.f32 %v783_v63, %v257_v51  ;;  %v1386_v35 = vmax.f32 %v207_v11, 1e-24  ;;  %786 = vrsqrt.f32 %v254_v56  ;;  %vm503_vm15 = vweird.f32 %v783_v63 }
 0x124   :  { %v490_v29 = vsub.f32 1.5, %v489_v34  ;;  %vm1400_vm0 = vmor %vm502_vm14, %vm503_vm15  ;;  %vm472_vm2 = vweird.f32 %v254_v56 }
 0x125   :  { %v498_v61 = vmul.f32 %v783_v63, %v497_v42  ;;  %788 = vrsqrt.f32 %v1386_v35  ;;  %vm452_vm7 = vweird.f32 %v1386_v35 }
 0x126   :  { %v491_v45 = vmul.f32 %v781_v50, %v490_v29 }
 0x127   :  { %v499_v40 = vmul.f32 0.5, %v498_v61  ;;  %v203_v24 = vpop.xlane.xlu1 %202 }
 0x128   :  { %v785_v10 = vpop.eup %784  ;;  %v1393_v4 = vmax.f32 %v203_v24, 1e-24  ;;  %v495_v26 = vsel %vm1389_vm13, %v781_v50, %v491_v45 }
 0x129   :  { %v500_v62 = vsub.f32 1.5, %v499_v40  ;;  %v209_v53 = vpop.xlane.xlu0 %208  ;;  %v787_v2 = vpop.eup %786  ;;  %v477_v55 = vmul.f32 %v785_v10, %v255_v9  ;;  %vm483_vm3 = vweird.f32 %v785_v10  ;;  %v608_v58 = vmul.f32 %v495_v26, %v1148_v21 }
 0x12a   :  { %v253_v5 = vmax.f32 %v209_v53, 1e-24  ;;  %v205_v31 = vpop.xlane.xlu2 %204  ;;  %v467_v30 = vmul.f32 %v787_v2, %v254_v56  ;;  %790 = vrsqrt.f32 %v1393_v4  ;;  %vm473_vm4 = vweird.f32 %v787_v2  ;;  %vm1412_vm5 = vmor %vm482_vm1, %vm483_vm3 }
 0x12b   :  { %v1395_v57 = vpop.eup %788  ;;  %v478_v59 = vmul.f32 %v785_v10, %v477_v55  ;;  %v251_v38 = vmax.f32 %v205_v31, 1e-24  ;;  %v501_v14 = vmul.f32 %v783_v63, %v500_v62  ;;  %vm1417_vm6 = vmor %vm472_vm2, %vm473_vm4  ;;  %vm432_vm13 = vweird.f32 %v1393_v4 }
 0x12c   :  { %792 = vrsqrt.f32 %v253_v5  ;;  %v447_v22 = vmul.f32 %v1395_v57, %v1386_v35  ;;  %v468_v27 = vmul.f32 %v787_v2, %v467_v30  ;;  %vm453_vm8 = vweird.f32 %v1395_v57 }
 0x12d   :  { %v479_v39 = vmul.f32 0.5, %v478_v59  ;;  %794 = vrsqrt.f32 %v251_v38  ;;  %v505_v8 = vsel %vm1400_vm0, %v783_v63, %v501_v14  ;;  %vm1429_vm9 = vmor %vm452_vm7, %vm453_vm8  ;;  %vm462_vm10 = vweird.f32 %v253_v5 }
 0x12e   :  { %v448_v18 = vmul.f32 %v1395_v57, %v447_v22  ;;  %v469_v13 = vmul.f32 0.5, %v468_v27  ;;  %v609_v12 = vmul.f32 %v505_v8, %v1158_v33  ;;  %vm442_vm15 = vweird.f32 %v251_v38 }
 0x12f   :  { %v480_v15 = vsub.f32 1.5, %v479_v39  ;;  %vm99_vm3 = vcmask 64512  }
 0x130   :  { %v449_v37 = vmul.f32 0.5, %v448_v18  ;;  %v791_v52 = vpop.eup %790  ;;  %v470_v7 = vsub.f32 1.5, %v469_v13  ;;  %v629_v47 = vpack.c.bf16 %v609_v12, %v608_v58 }
 0x131   :  { %v427_v48 = vmul.f32 %v791_v52, %v1393_v4  ;;  %v481_v46 = vmul.f32 %v785_v10, %v480_v15  ;;  %vm433_vm14 = vweird.f32 %v791_v52 }
 0x132   :  { %v793_v1 = vpop.eup %792  ;;  %v450_v51 = vsub.f32 1.5, %v449_v37  ;;  %v471_v28 = vmul.f32 %v787_v2, %v470_v7  ;;  %652 = vmatpush.bf16.xpose.msra.mxu2 %v629_v47  ;;  %vm434_vm1 = vmor %vm432_vm13, %vm433_vm14 }
 0x133   :  { %v457_v33 = vmul.f32 %v793_v1, %v253_v5  ;;  %v428_v60 = vmul.f32 %v791_v52, %v427_v48  ;;  %v795_v41 = vpop.eup %794  ;;  %v485_v19 = vsel %vm1412_vm5, %v785_v10, %v481_v46  ;;  %vm463_vm11 = vweird.f32 %v793_v1 }
 0x134   :  { %v475_v0 = vsel %vm1417_vm6, %v787_v2, %v471_v28  ;;  %v451_v20 = vmul.f32 %v1395_v57, %v450_v51  ;;  %v437_v6 = vmul.f32 %v795_v41, %v251_v38  ;;  %v607_v56 = vmul.f32 %v485_v19, %v1221_v44  ;;  %vm1438_vm12 = vmor %vm462_vm10, %vm463_vm11 }
 0x135   :  { %v458_v50 = vmul.f32 %v793_v1, %v457_v33  ;;  %v429_v9 = vmul.f32 0.5, %v428_v60  ;;  %v606_v43 = vmul.f32 %v475_v0, %v1223_v54  ;;  %vm443_vm0 = vweird.f32 %v795_v41 }
 0x136   :  { %v438_v11 = vmul.f32 %v795_v41, %v437_v6  ;;  %v455_v29 = vsel %vm1429_vm9, %v1395_v57, %v451_v20  ;;  %vm444_vm2 = vmor %vm442_vm15, %vm443_vm0  ;;  %vm103_vm5 = vcmask 7168  }
 0x137   :  { %v459_v42 = vmul.f32 0.5, %v458_v50  ;;  %v430_v34 = vsub.f32 1.5, %v429_v9  ;;  %v628_v61 = vpack.c.bf16 %v607_v56, %v606_v43  ;;  %v604_v24 = vmul.f32 %v455_v29, %v1244_v49 }
 0x138   :  { %v439_v54 = vmul.f32 0.5, %v438_v11 }
 0x139   :  { %v460_v35 = vsub.f32 1.5, %v459_v42  ;;  %v431_v53 = vmul.f32 %v791_v52, %v430_v34 }
 0x13a   :  { %v440_v44 = vsub.f32 1.5, %v439_v54  ;;  %653 = vmatpush.bf16.xpose.msra.mxu2 %v628_v61 }
 0x13b   :  { %v461_v23 = vmul.f32 %v793_v1, %v460_v35  ;;  %v435_v57 = vsel %vm434_vm1, %v791_v52, %v431_v53 }
 0x13c   :  { %v441_v4 = vmul.f32 %v795_v41, %v440_v44  ;;  %v602_v49 = vmul.f32 %v435_v57, %v1269_v17  ;;  %v885_v17 = vmov -1.442695e+30  }
 0x13d   :  { %v465_v10 = vsel %vm1438_vm12, %v793_v1, %v461_v23 }
 0x13e   :  { %v605_v2 = vmul.f32 %v465_v10, %v1280_v3  ;;  %v445_v30 = vsel %vm444_vm2, %v795_v41, %v441_v4  ;;  %v683_v3 = vlaneseq }
 0x13f   :  { %v603_v26 = vmul.f32 %v445_v30, %v1290_v36 }
 0x140   :  { %v627_v5 = vpack.c.bf16 %v605_v2, %v604_v24  ;;  %v684_v38 = vand.u32 127, %v683_v3 }
 0x141   :  { %v91_v45 = vpop.f32.mrf.mxu0  ;;  %v626_v59 = vpack.c.bf16 %v603_v26, %v602_v49 }
 0x142   :  { %v95_v62 = vmul.f32 2.0, %v91_v45  ;;  %654 = vmatpush.bf16.xpose.msra.mxu2 %v627_v5  ;;  %vm686_vm4 = vcmp.lt.s32.totalorder %v684_v38, 16 }
 0x144   :  { %v720_v55 = vadd.f32 -2.0, %v95_v62 }
 0x146   :  { %v97_v31 = vmul.f32 1.442695, %v720_v55 }
 0x148   :  { %796 = vpow2.f32 %v97_v31 }
 0x149   :  { %v93_v32 = vpop.f32.mrf.mxu0  ;;  %798 = vpow2.f32 %v885_v17 }
 0x14a   :  { %655 = vmatpush.bf16.xpose.msra.mxu2 %v626_v59 }
 0x14e   :  { %v797_v22 = vpop.eup %796 }
 0x14f   :  { %v100_v27 = vsel %vm99_vm3, %v797_v22, 0.0  ;;  %v799_v8 = vpop.eup %798 }
 0x150   :  { %101 = vadd.xlane.f32.xlu0 %v100_v27 }
 0x151   :  { %656 = vmatmul.bf16.vlgmr.msra.gmra.mxu2 %v1375_v25 }
 0x160   :  { %v644_v14 = vpop.f32.mrf.mxu1 }
 0x161   :  { %v661_v39 = vmul.f32 2.0, %v644_v14 }
 0x163   :  { %v688_v18 = vsel %vm686_vm4, %v661_v39, -1e+30 }
 0x164   :  { %v723_v58 = vadd.f32 -2.0, %v688_v18 }
 0x166   :  { %v693_v13 = vmul.f32 1.442695, %v723_v58 }
 0x168   :  { %800 = vpow2.f32 %v693_v13  ;;  %v646_v36 = vpop.f32.mrf.mxu1 }
 0x16e   :  { %v801_v15 = vpop.eup %800 }
 0x16f   :  { %v697_v37 = vadd.f32 %v801_v15, %v799_v8 }
 0x171   :  { %698 = vadd.xlane.f32.xlu1 %v697_v37 }
 0x1c3   :  { %v102_v12 = vpop.xlane.xlu0 %101 }
 0x1c4   :  { %104 = vst.msk [vmem:[#allocation3] sm:$0xff] %vm103_vm5, %v102_v12 }
 0x1c5   :  { %105 = vst.msk [vmem:[#allocation2] sm:$0xff] %vm103_vm5, %v102_v12 }
 0x1cb   :  { %v708_v25 = vld [vmem:[#allocation3] sm:$0xff] }
 0x1cc   :  { %709 = vst.msk [vmem:[%s1465_s4] sm:$0xff] %vm103_vm5, %v708_v25  ;;  %v690_v16 = vld [vmem:[#allocation2] sm:$0xff] }
 0x1d4   :  { %v657_v52 = vpop.f32.mrf.mxu2 }
 0x1dc   :  { %v659_v21 = vpop.f32.mrf.mxu2 }
 0x1e4   :  { %v699_v7 = vpop.xlane.xlu1 %698 }
 0x1e5   :  { %v700_v1 = vadd.f32 %v699_v7, %v690_v16 }
 0x1e7   :  { %702 = vst.msk [vmem:[#allocation2] sm:$0xff] %vm103_vm5, %v700_v1 }
 0x1ee   :  { %v703_v51 = vld [vmem:[#allocation2] sm:$0xff] }
 0x1ef   :  { %802 = vlog2.f32 %v703_v51 }
 0x1f5   :  { %v803_v48 = vpop.eup %802 }
 0x1f6   :  { %v705_v47 = vmul.f32 0.6931472, %v803_v48 }
 0x1f8   :  { %v706_v33 = vadd.f32 2.0, %v705_v47 }
 0x1fa   :  { %707 = vst.msk [vmem:[%s1464_s3] sm:$0xff] %vm103_vm5, %v706_v33 }
 0x1fb   :  { %718 = vsyncpa [#allocation5], 1 }
 0x1fc   :  { %719 = vsyncpa [#allocation7], 1 }

</bundles_post_ra>
